<compile_context>
chip_gen: v6e
topology: v6e:2x2x1
jax: 0.10.0
libtpu: 0.0.40
codegen_flags: <defaults>
</compile_context>

<pallas_src>
import functools

import numpy as np
import jax
import jax.numpy as jnp
from jax.experimental import pallas as pl
from jax.experimental.pallas import tpu as pltpu


# ------------------------------ fused kernel --------------------------------

def _fp_predictor_kernel(x_ref, w1_ref, b1_ref, g1_ref, be1_ref,
                         w2_ref, b2_ref, g2_ref, be2_ref,
                         wfc_ref, bfc_ref, o_ref, *, T, eps):
    # x_ref block: [1, T+2, C_in] (time already zero-padded by 1 on each side)
    xp = x_ref[0]                                   # [T+2, C_in] f32

    # ---- Conv1d(C_in, D, k=3, pad=1) + ReLU : three shifted matmuls ----
    w1 = w1_ref[...].astype(jnp.bfloat16)           # [3, C_in, D]
    h = (jnp.dot(xp[0:T, :].astype(jnp.bfloat16), w1[0],
                 preferred_element_type=jnp.float32)
         + jnp.dot(xp[1:T + 1, :].astype(jnp.bfloat16), w1[1],
                   preferred_element_type=jnp.float32)
         + jnp.dot(xp[2:T + 2, :].astype(jnp.bfloat16), w1[2],
                   preferred_element_type=jnp.float32)
         + b1_ref[...])                             # [T, D] f32
    h = jnp.maximum(h, 0.0)

    # ---- LayerNorm1 (eps=1e-6), dropout_inner == identity in eval ----
    mu = jnp.mean(h, axis=-1, keepdims=True)
    var = jnp.mean((h - mu) ** 2, axis=-1, keepdims=True)
    h = (h - mu) * jax.lax.rsqrt(var + eps) * g1_ref[...] + be1_ref[...]

    # ---- Conv1d(D, C_in, k=1) == per-token linear, + ReLU ----
    h2 = jnp.dot(h.astype(jnp.bfloat16), w2_ref[...].astype(jnp.bfloat16),
                 preferred_element_type=jnp.float32) + b2_ref[...]   # [T, C_in]
    h2 = jnp.maximum(h2, 0.0)

    # ---- LayerNorm2 (eps=1e-6), dropout == identity in eval ----
    mu2 = jnp.mean(h2, axis=-1, keepdims=True)
    var2 = jnp.mean((h2 - mu2) ** 2, axis=-1, keepdims=True)
    h2 = (h2 - mu2) * jax.lax.rsqrt(var2 + eps) * g2_ref[...] + be2_ref[...]

    # ---- fc: Linear(C_in, 4) + softmax(dim=-1) ----
    logits = jnp.dot(h2.astype(jnp.bfloat16), wfc_ref[...].astype(jnp.bfloat16),
                     preferred_element_type=jnp.float32) + bfc_ref[...]  # [T, 4]
    m = jnp.max(logits, axis=-1, keepdims=True)
    e = jnp.exp(logits - m)
    denom = jnp.sum(e, axis=-1, keepdims=True)
    out = e * pl.reciprocal(denom, approx=True)

    o_ref[0] = out.astype(o_ref.dtype)


def fp_predictor_pallas(params, x):
    B, T, C_in = x.shape
    # Zero-pad the time axis once on the host so the k=3 conv needs only
    # static in-kernel window slices (no halo exchange / re-DMA).
    x_pad = jnp.pad(x, ((0, 0), (1, 1), (0, 0)))

    def full_spec(arr):
        shp = arr.shape
        return pl.BlockSpec(shp, lambda b, _s=shp: (0,) * len(_s))

    kernel = functools.partial(_fp_predictor_kernel, T=T, eps=1e-6)
    return pl.pallas_call(
        kernel,
        out_shape=jax.ShapeDtypeStruct((B, T, 4), jnp.float32),
        grid=(B,),
        in_specs=[
            pl.BlockSpec((1, T + 2, C_in), lambda b: (b, 0, 0)),
            full_spec(params['w1']), full_spec(params['b1']),
            full_spec(params['g1']), full_spec(params['be1']),
            full_spec(params['w2']), full_spec(params['b2']),
            full_spec(params['g2']), full_spec(params['be2']),
            full_spec(params['wfc']), full_spec(params['bfc']),
        ],
        out_specs=pl.BlockSpec((1, T, 4), lambda b: (b, 0, 0)),
        compiler_params=pltpu.CompilerParams(
            dimension_semantics=("parallel",)),
    )(x_pad, params['w1'], params['b1'], params['g1'], params['be1'],
      params['w2'], params['b2'], params['g2'], params['be2'],
      params['wfc'], params['bfc'])


# --------------------------- pure-JAX reference ------------------------------

def _ln_ref(x, g, b, eps=1e-6):
    mu = jnp.mean(x, axis=-1, keepdims=True)
    var = jnp.mean((x - mu) ** 2, axis=-1, keepdims=True)
    return (x - mu) * jax.lax.rsqrt(var + eps) * g + b


def fp_predictor_ref(params, x):
    B, T, C_in = x.shape
    xp = jnp.pad(x, ((0, 0), (1, 1), (0, 0)))
    h = sum(jnp.einsum('btc,cd->btd', xp[:, k:k + T, :], params['w1'][k])
            for k in range(3)) + params['b1']
    h = jnp.maximum(h, 0.0)
    h = _ln_ref(h, params['g1'], params['be1'])
    h2 = jnp.einsum('btd,dc->btc', h, params['w2']) + params['b2']
    h2 = jnp.maximum(h2, 0.0)
    h2 = _ln_ref(h2, params['g2'], params['be2'])
    logits = jnp.einsum('btc,ck->btk', h2, params['wfc']) + params['bfc']
    return jax.nn.softmax(logits, axis=-1)


# ------------------------------- parameters ----------------------------------

def init_params(key, encoder_projection_units, embedding_dim):
    c_in = encoder_projection_units
    d_half = embedding_dim // 2
    ks = iter(jax.random.split(key, 8))

    def u(k, shape, bound):
        return jax.random.uniform(k, shape, jnp.float32, -bound, bound)

    b1 = 1.0 / np.sqrt(c_in * 3)        # Conv1d(c_in, d_half, k=3) default init
    b2 = 1.0 / np.sqrt(d_half * 1)      # Conv1d(d_half, c_in, k=1)
    bf = 1.0 / np.sqrt(c_in)            # Linear(c_in, 4)
    return {
        'w1': u(next(ks), (3, c_in, d_half), b1),    # tap-major, channels-last
        'b1': u(next(ks), (1, d_half), b1),
        'g1': jnp.ones((1, d_half), jnp.float32),
        'be1': jnp.zeros((1, d_half), jnp.float32),
        'w2': u(next(ks), (d_half, c_in), b2),
        'b2': u(next(ks), (1, c_in), b2),
        'g2': jnp.ones((1, c_in), jnp.float32),
        'be2': jnp.zeros((1, c_in), jnp.float32),
        'wfc': u(next(ks), (c_in, 4), bf),
        'bfc': u(next(ks), (1, 4), bf),
    }


# ----------------------------------- main -------------------------------------

if __name__ == "__main__":
    CONFIG = dict(encoder_projection_units=8, embedding_dim=32)

    key = jax.random.PRNGKey(0)
    pkey, xkey = jax.random.split(key)
    params = init_params(pkey, CONFIG['encoder_projection_units'],
                         CONFIG['embedding_dim'])

    B, T = 2, 16
    x = jax.random.normal(xkey, (B, T, CONFIG['encoder_projection_units']),
                          jnp.float32)

    out = fp_predictor_pallas(params, x)
    out = jax.block_until_ready(out)
    assert out.shape == (B, T, 4), out.shape

    ref = fp_predictor_ref(params, x)
    # Kernel uses bf16 MXU inputs (f32 accumulation) + approx reciprocal;
    # reference is plain f32 jnp — compare at a tolerance that covers bf16 rounding.
    np.testing.assert_allclose(np.asarray(out), np.asarray(ref),
                               rtol=2e-2, atol=2e-2)
    # softmax rows should sum to ~1
    np.testing.assert_allclose(np.asarray(out).sum(-1), 1.0, atol=1e-2)
    print("KERNEL_OK")
</pallas_src>

<mosaic_0001>
module attributes {stable_mosaic.version = 11 : i64} {
  func.func @_fp_predictor_kernel(%arg0: i32, %arg1: memref<1x18x8xf32, #tpu.memory_space<vmem>>, %arg2: memref<3x8x16xf32, #tpu.memory_space<vmem>>, %arg3: memref<1x16xf32, #tpu.memory_space<vmem>>, %arg4: memref<1x16xf32, #tpu.memory_space<vmem>>, %arg5: memref<1x16xf32, #tpu.memory_space<vmem>>, %arg6: memref<16x8xf32, #tpu.memory_space<vmem>>, %arg7: memref<1x8xf32, #tpu.memory_space<vmem>>, %arg8: memref<1x8xf32, #tpu.memory_space<vmem>>, %arg9: memref<1x8xf32, #tpu.memory_space<vmem>>, %arg10: memref<8x4xf32, #tpu.memory_space<vmem>>, %arg11: memref<1x4xf32, #tpu.memory_space<vmem>>, %arg12: memref<1x16x4xf32, #tpu.memory_space<vmem>>) attributes {dimension_semantics = [#tpu.dimension_semantics<parallel>], iteration_bounds = array<i64: 2>, scalar_prefetch = 0 : i64, scratch_operands = 0 : i64, tpu.core_type = #tpu.core_type<tc>, window_params = [{transform_indices = @transform_0, window_bounds = array<i64: 1, 18, 8>}, {pipeline_mode = #tpu.pipeline_mode<synchronous>, transform_indices = @transform_1, window_bounds = array<i64: 3, 8, 16>}, {pipeline_mode = #tpu.pipeline_mode<synchronous>, transform_indices = @transform_2, window_bounds = array<i64: 1, 16>}, {pipeline_mode = #tpu.pipeline_mode<synchronous>, transform_indices = @transform_3, window_bounds = array<i64: 1, 16>}, {pipeline_mode = #tpu.pipeline_mode<synchronous>, transform_indices = @transform_4, window_bounds = array<i64: 1, 16>}, {pipeline_mode = #tpu.pipeline_mode<synchronous>, transform_indices = @transform_5, window_bounds = array<i64: 16, 8>}, {pipeline_mode = #tpu.pipeline_mode<synchronous>, transform_indices = @transform_6, window_bounds = array<i64: 1, 8>}, {pipeline_mode = #tpu.pipeline_mode<synchronous>, transform_indices = @transform_7, window_bounds = array<i64: 1, 8>}, {pipeline_mode = #tpu.pipeline_mode<synchronous>, transform_indices = @transform_8, window_bounds = array<i64: 1, 8>}, {pipeline_mode = #tpu.pipeline_mode<synchronous>, transform_indices = @transform_9, window_bounds = array<i64: 8, 4>}, {pipeline_mode = #tpu.pipeline_mode<synchronous>, transform_indices = @transform_10, window_bounds = array<i64: 1, 4>}, {transform_indices = @transform_11, window_bounds = array<i64: 1, 16, 4>}]} {
    %c0 = arith.constant 0 : index
    %c0_0 = arith.constant 0 : index
    %c0_1 = arith.constant 0 : index
    %0 = vector.load %arg1[%c0, %c0_0, %c0_1] : memref<1x18x8xf32, #tpu.memory_space<vmem>>, vector<1x18x8xf32>
    %1 = vector.shape_cast %0 : vector<1x18x8xf32> to vector<18x8xf32>
    %c0_2 = arith.constant 0 : index
    %c0_3 = arith.constant 0 : index
    %c0_4 = arith.constant 0 : index
    %2 = vector.load %arg2[%c0_2, %c0_3, %c0_4] : memref<3x8x16xf32, #tpu.memory_space<vmem>>, vector<3x8x16xf32>
    %3 = arith.truncf %2 : vector<3x8x16xf32> to vector<3x8x16xbf16>
    %4 = vector.extract_strided_slice %1 {offsets = [0, 0], sizes = [16, 8], strides = [1, 1]} : vector<18x8xf32> to vector<16x8xf32>
    %5 = arith.truncf %4 : vector<16x8xf32> to vector<16x8xbf16>
    %6 = vector.extract_strided_slice %3 {offsets = [0, 0, 0], sizes = [1, 8, 16], strides = [1, 1, 1]} : vector<3x8x16xbf16> to vector<1x8x16xbf16>
    %7 = vector.shape_cast %6 : vector<1x8x16xbf16> to vector<8x16xbf16>
    %cst = arith.constant dense<0.000000e+00> : vector<16x16xf32>
    %8 = tpu.matmul %5, %7, %cst {dimension_numbers = #tpu.dot_dimension_numbers<[1], [0], [0], [1], [0, 0, 1, 1], [], []>} : vector<16x8xbf16>, vector<8x16xbf16>, vector<16x16xf32> -> vector<16x16xf32>
    %9 = vector.extract_strided_slice %1 {offsets = [1, 0], sizes = [16, 8], strides = [1, 1]} : vector<18x8xf32> to vector<16x8xf32>
    %10 = arith.truncf %9 : vector<16x8xf32> to vector<16x8xbf16>
    %11 = vector.extract_strided_slice %3 {offsets = [1, 0, 0], sizes = [1, 8, 16], strides = [1, 1, 1]} : vector<3x8x16xbf16> to vector<1x8x16xbf16>
    %12 = vector.shape_cast %11 : vector<1x8x16xbf16> to vector<8x16xbf16>
    %cst_5 = arith.constant dense<0.000000e+00> : vector<16x16xf32>
    %13 = tpu.matmul %10, %12, %cst_5 {dimension_numbers = #tpu.dot_dimension_numbers<[1], [0], [0], [1], [0, 0, 1, 1], [], []>} : vector<16x8xbf16>, vector<8x16xbf16>, vector<16x16xf32> -> vector<16x16xf32>
    %14 = arith.addf %8, %13 : vector<16x16xf32>
    %15 = vector.extract_strided_slice %1 {offsets = [2, 0], sizes = [16, 8], strides = [1, 1]} : vector<18x8xf32> to vector<16x8xf32>
    %16 = arith.truncf %15 : vector<16x8xf32> to vector<16x8xbf16>
    %17 = vector.extract_strided_slice %3 {offsets = [2, 0, 0], sizes = [1, 8, 16], strides = [1, 1, 1]} : vector<3x8x16xbf16> to vector<1x8x16xbf16>
    %18 = vector.shape_cast %17 : vector<1x8x16xbf16> to vector<8x16xbf16>
    %cst_6 = arith.constant dense<0.000000e+00> : vector<16x16xf32>
    %19 = tpu.matmul %16, %18, %cst_6 {dimension_numbers = #tpu.dot_dimension_numbers<[1], [0], [0], [1], [0, 0, 1, 1], [], []>} : vector<16x8xbf16>, vector<8x16xbf16>, vector<16x16xf32> -> vector<16x16xf32>
    %20 = arith.addf %14, %19 : vector<16x16xf32>
    %c0_7 = arith.constant 0 : index
    %c0_8 = arith.constant 0 : index
    %21 = vector.load %arg3[%c0_7, %c0_8] : memref<1x16xf32, #tpu.memory_space<vmem>>, vector<1x16xf32>
    %22 = vector.broadcast %21 : vector<1x16xf32> to vector<16x16xf32>
    %23 = arith.addf %20, %22 : vector<16x16xf32>
    %cst_9 = arith.constant 0.000000e+00 : f32
    %24 = vector.broadcast %cst_9 : f32 to vector<16x16xf32>
    %25 = arith.maximumf %23, %24 : vector<16x16xf32>
    %cst_10 = arith.constant dense<0.000000e+00> : vector<16xf32>
    %26 = vector.multi_reduction <add>, %25, %cst_10 [1] : vector<16x16xf32> to vector<16xf32>
    %27 = vector.shape_cast %26 : vector<16xf32> to vector<16x1xf32>
    %cst_11 = arith.constant 1.600000e+01 : f32
    %28 = vector.broadcast %cst_11 : f32 to vector<16x1xf32>
    %29 = arith.divf %27, %28 : vector<16x1xf32>
    %30 = vector.broadcast %29 : vector<16x1xf32> to vector<16x16xf32>
    %31 = arith.subf %25, %30 : vector<16x16xf32>
    %32 = arith.mulf %31, %31 : vector<16x16xf32>
    %cst_12 = arith.constant dense<0.000000e+00> : vector<16xf32>
    %33 = vector.multi_reduction <add>, %32, %cst_12 [1] : vector<16x16xf32> to vector<16xf32>
    %34 = vector.shape_cast %33 : vector<16xf32> to vector<16x1xf32>
    %cst_13 = arith.constant 1.600000e+01 : f32
    %35 = vector.broadcast %cst_13 : f32 to vector<16x1xf32>
    %36 = arith.divf %34, %35 : vector<16x1xf32>
    %37 = vector.broadcast %29 : vector<16x1xf32> to vector<16x16xf32>
    %38 = arith.subf %25, %37 : vector<16x16xf32>
    %cst_14 = arith.constant 9.99999997E-7 : f32
    %39 = vector.broadcast %cst_14 : f32 to vector<16x1xf32>
    %40 = arith.addf %36, %39 : vector<16x1xf32>
    %41 = math.rsqrt %40 : vector<16x1xf32>
    %42 = vector.broadcast %41 : vector<16x1xf32> to vector<16x16xf32>
    %43 = arith.mulf %38, %42 : vector<16x16xf32>
    %c0_15 = arith.constant 0 : index
    %c0_16 = arith.constant 0 : index
    %44 = vector.load %arg4[%c0_15, %c0_16] : memref<1x16xf32, #tpu.memory_space<vmem>>, vector<1x16xf32>
    %45 = vector.broadcast %44 : vector<1x16xf32> to vector<16x16xf32>
    %46 = arith.mulf %43, %45 : vector<16x16xf32>
    %c0_17 = arith.constant 0 : index
    %c0_18 = arith.constant 0 : index
    %47 = vector.load %arg5[%c0_17, %c0_18] : memref<1x16xf32, #tpu.memory_space<vmem>>, vector<1x16xf32>
    %48 = vector.broadcast %47 : vector<1x16xf32> to vector<16x16xf32>
    %49 = arith.addf %46, %48 : vector<16x16xf32>
    %50 = arith.truncf %49 : vector<16x16xf32> to vector<16x16xbf16>
    %c0_19 = arith.constant 0 : index
    %c0_20 = arith.constant 0 : index
    %51 = vector.load %arg6[%c0_19, %c0_20] : memref<16x8xf32, #tpu.memory_space<vmem>>, vector<16x8xf32>
    %52 = arith.truncf %51 : vector<16x8xf32> to vector<16x8xbf16>
    %cst_21 = arith.constant dense<0.000000e+00> : vector<16x8xf32>
    %53 = tpu.matmul %50, %52, %cst_21 {dimension_numbers = #tpu.dot_dimension_numbers<[1], [0], [0], [1], [0, 0, 1, 1], [], []>} : vector<16x16xbf16>, vector<16x8xbf16>, vector<16x8xf32> -> vector<16x8xf32>
    %c0_22 = arith.constant 0 : index
    %c0_23 = arith.constant 0 : index
    %54 = vector.load %arg7[%c0_22, %c0_23] : memref<1x8xf32, #tpu.memory_space<vmem>>, vector<1x8xf32>
    %55 = vector.broadcast %54 : vector<1x8xf32> to vector<16x8xf32>
    %56 = arith.addf %53, %55 : vector<16x8xf32>
    %cst_24 = arith.constant 0.000000e+00 : f32
    %57 = vector.broadcast %cst_24 : f32 to vector<16x8xf32>
    %58 = arith.maximumf %56, %57 : vector<16x8xf32>
    %cst_25 = arith.constant dense<0.000000e+00> : vector<16xf32>
    %59 = vector.multi_reduction <add>, %58, %cst_25 [1] : vector<16x8xf32> to vector<16xf32>
    %60 = vector.shape_cast %59 : vector<16xf32> to vector<16x1xf32>
    %cst_26 = arith.constant 8.000000e+00 : f32
    %61 = vector.broadcast %cst_26 : f32 to vector<16x1xf32>
    %62 = arith.divf %60, %61 : vector<16x1xf32>
    %63 = vector.broadcast %62 : vector<16x1xf32> to vector<16x8xf32>
    %64 = arith.subf %58, %63 : vector<16x8xf32>
    %65 = arith.mulf %64, %64 : vector<16x8xf32>
    %cst_27 = arith.constant dense<0.000000e+00> : vector<16xf32>
    %66 = vector.multi_reduction <add>, %65, %cst_27 [1] : vector<16x8xf32> to vector<16xf32>
    %67 = vector.shape_cast %66 : vector<16xf32> to vector<16x1xf32>
    %cst_28 = arith.constant 8.000000e+00 : f32
    %68 = vector.broadcast %cst_28 : f32 to vector<16x1xf32>
    %69 = arith.divf %67, %68 : vector<16x1xf32>
    %70 = vector.broadcast %62 : vector<16x1xf32> to vector<16x8xf32>
    %71 = arith.subf %58, %70 : vector<16x8xf32>
    %cst_29 = arith.constant 9.99999997E-7 : f32
    %72 = vector.broadcast %cst_29 : f32 to vector<16x1xf32>
    %73 = arith.addf %69, %72 : vector<16x1xf32>
    %74 = math.rsqrt %73 : vector<16x1xf32>
    %75 = vector.broadcast %74 : vector<16x1xf32> to vector<16x8xf32>
    %76 = arith.mulf %71, %75 : vector<16x8xf32>
    %c0_30 = arith.constant 0 : index
    %c0_31 = arith.constant 0 : index
    %77 = vector.load %arg8[%c0_30, %c0_31] : memref<1x8xf32, #tpu.memory_space<vmem>>, vector<1x8xf32>
    %78 = vector.broadcast %77 : vector<1x8xf32> to vector<16x8xf32>
    %79 = arith.mulf %76, %78 : vector<16x8xf32>
    %c0_32 = arith.constant 0 : index
    %c0_33 = arith.constant 0 : index
    %80 = vector.load %arg9[%c0_32, %c0_33] : memref<1x8xf32, #tpu.memory_space<vmem>>, vector<1x8xf32>
    %81 = vector.broadcast %80 : vector<1x8xf32> to vector<16x8xf32>
    %82 = arith.addf %79, %81 : vector<16x8xf32>
    %83 = arith.truncf %82 : vector<16x8xf32> to vector<16x8xbf16>
    %c0_34 = arith.constant 0 : index
    %c0_35 = arith.constant 0 : index
    %84 = vector.load %arg10[%c0_34, %c0_35] : memref<8x4xf32, #tpu.memory_space<vmem>>, vector<8x4xf32>
    %85 = arith.truncf %84 : vector<8x4xf32> to vector<8x4xbf16>
    %cst_36 = arith.constant dense<0.000000e+00> : vector<16x4xf32>
    %86 = tpu.matmul %83, %85, %cst_36 {dimension_numbers = #tpu.dot_dimension_numbers<[1], [0], [0], [1], [0, 0, 1, 1], [], []>} : vector<16x8xbf16>, vector<8x4xbf16>, vector<16x4xf32> -> vector<16x4xf32>
    %c0_37 = arith.constant 0 : index
    %c0_38 = arith.constant 0 : index
    %87 = vector.load %arg11[%c0_37, %c0_38] : memref<1x4xf32, #tpu.memory_space<vmem>>, vector<1x4xf32>
    %88 = vector.broadcast %87 : vector<1x4xf32> to vector<16x4xf32>
    %89 = arith.addf %86, %88 : vector<16x4xf32>
    %cst_39 = arith.constant dense<0xFF800000> : vector<16xf32>
    %90 = vector.multi_reduction <maximumf>, %89, %cst_39 [1] : vector<16x4xf32> to vector<16xf32>
    %91 = vector.shape_cast %90 : vector<16xf32> to vector<16x1xf32>
    %92 = vector.broadcast %91 : vector<16x1xf32> to vector<16x4xf32>
    %93 = arith.subf %89, %92 : vector<16x4xf32>
    %94 = math.exp %93 : vector<16x4xf32>
    %cst_40 = arith.constant dense<0.000000e+00> : vector<16xf32>
    %95 = vector.multi_reduction <add>, %94, %cst_40 [1] : vector<16x4xf32> to vector<16xf32>
    %96 = vector.shape_cast %95 : vector<16xf32> to vector<16x1xf32>
    %97 = tpu.reciprocal %96 {approx = true} : vector<16x1xf32> -> vector<16x1xf32>
    %98 = vector.broadcast %97 : vector<16x1xf32> to vector<16x4xf32>
    %99 = arith.mulf %94, %98 : vector<16x4xf32>
    %c0_41 = arith.constant 0 : index
    %c0_42 = arith.constant 0 : index
    %c0_43 = arith.constant 0 : index
    %100 = vector.load %arg12[%c0_41, %c0_42, %c0_43] : memref<1x16x4xf32, #tpu.memory_space<vmem>>, vector<1x16x4xf32>
    %101 = vector.shape_cast %100 : vector<1x16x4xf32> to vector<16x4xf32>
    %102 = vector.shape_cast %99 : vector<16x4xf32> to vector<1x16x4xf32>
    tpu.vector_store %arg12[%c0_41, %c0_42, %c0_43], %102 {strides = array<i32>} : memref<1x16x4xf32, #tpu.memory_space<vmem>>, vector<1x16x4xf32>,
    return
  }
  func.func @transform_0(%arg0: i32) -> (i32, i32, i32) {
    %c0_i32 = arith.constant 0 : i32
    %c0_i32_0 = arith.constant 0 : i32
    %c0_i32_1 = arith.constant 0 : i32
    return %arg0, %c0_i32, %c0_i32_0 : i32, i32, i32
  }
  func.func @transform_1(%arg0: i32) -> (i32, i32, i32) {
    %c0_i32 = arith.constant 0 : i32
    %c0_i32_0 = arith.constant 0 : i32
    %c0_i32_1 = arith.constant 0 : i32
    %c0_i32_2 = arith.constant 0 : i32
    return %c0_i32, %c0_i32_0, %c0_i32_1 : i32, i32, i32
  }
  func.func @transform_2(%arg0: i32) -> (i32, i32) {
    %c0_i32 = arith.constant 0 : i32
    %c0_i32_0 = arith.constant 0 : i32
    %c0_i32_1 = arith.constant 0 : i32
    return %c0_i32, %c0_i32_0 : i32, i32
  }
  func.func @transform_3(%arg0: i32) -> (i32, i32) {
    %c0_i32 = arith.constant 0 : i32
    %c0_i32_0 = arith.constant 0 : i32
    %c0_i32_1 = arith.constant 0 : i32
    return %c0_i32, %c0_i32_0 : i32, i32
  }
  func.func @transform_4(%arg0: i32) -> (i32, i32) {
    %c0_i32 = arith.constant 0 : i32
    %c0_i32_0 = arith.constant 0 : i32
    %c0_i32_1 = arith.constant 0 : i32
    return %c0_i32, %c0_i32_0 : i32, i32
  }
  func.func @transform_5(%arg0: i32) -> (i32, i32) {
    %c0_i32 = arith.constant 0 : i32
    %c0_i32_0 = arith.constant 0 : i32
    %c0_i32_1 = arith.constant 0 : i32
    return %c0_i32, %c0_i32_0 : i32, i32
  }
  func.func @transform_6(%arg0: i32) -> (i32, i32) {
    %c0_i32 = arith.constant 0 : i32
    %c0_i32_0 = arith.constant 0 : i32
    %c0_i32_1 = arith.constant 0 : i32
    return %c0_i32, %c0_i32_0 : i32, i32
  }
  func.func @transform_7(%arg0: i32) -> (i32, i32) {
    %c0_i32 = arith.constant 0 : i32
    %c0_i32_0 = arith.constant 0 : i32
    %c0_i32_1 = arith.constant 0 : i32
    return %c0_i32, %c0_i32_0 : i32, i32
  }
  func.func @transform_8(%arg0: i32) -> (i32, i32) {
    %c0_i32 = arith.constant 0 : i32
    %c0_i32_0 = arith.constant 0 : i32
    %c0_i32_1 = arith.constant 0 : i32
    return %c0_i32, %c0_i32_0 : i32, i32
  }
  func.func @transform_9(%arg0: i32) -> (i32, i32) {
    %c0_i32 = arith.constant 0 : i32
    %c0_i32_0 = arith.constant 0 : i32
    %c0_i32_1 = arith.constant 0 : i32
    return %c0_i32, %c0_i32_0 : i32, i32
  }
  func.func @transform_10(%arg0: i32) -> (i32, i32) {
    %c0_i32 = arith.constant 0 : i32
    %c0_i32_0 = arith.constant 0 : i32
    %c0_i32_1 = arith.constant 0 : i32
    return %c0_i32, %c0_i32_0 : i32, i32
  }
  func.func @transform_11(%arg0: i32) -> (i32, i32, i32) {
    %c0_i32 = arith.constant 0 : i32
    %c0_i32_0 = arith.constant 0 : i32
    %c0_i32_1 = arith.constant 0 : i32
    return %arg0, %c0_i32, %c0_i32_0 : i32, i32, i32
  }
}

</mosaic_0001>

<bundles_post_ra>
// kernel: tpu_custom_call.1
= control target key start
LH: loop header
LB: loop body
LE: loop exit
PB: predicated region body
PF: predicated region fallthrough
CT: control target
= control target key end

     0   :  { %s1018_s17 = smov 0   ;;  %s1106_s0 = inlined_call_operand.vmem [shape: f32[2,18,8], index: 0, kind: input, shape index: {}]   ;;  %s1107_s1 = inlined_call_operand.vmem [shape: f32[3,8,16], index: 1, kind: input, shape index: {}]   ;;  %s1108_s2 = inlined_call_operand.vmem [shape: f32[1,16], index: 2, kind: input, shape index: {}]   ;;  %s1109_s3 = inlined_call_operand.vmem [shape: f32[1,16], index: 3, kind: input, shape index: {}]   ;;  %s1110_s4 = inlined_call_operand.vmem [shape: f32[1,16], index: 4, kind: input, shape index: {}]   ;;  %s1111_s5 = inlined_call_operand.vmem [shape: f32[16,8], index: 5, kind: input, shape index: {}]   ;;  %s1112_s6 = inlined_call_operand.vmem [shape: f32[1,8], index: 6, kind: input, shape index: {}]   ;;  %s1113_s7 = inlined_call_operand.vmem [shape: f32[1,8], index: 7, kind: input, shape index: {}]   ;;  %s1114_s8 = inlined_call_operand.vmem [shape: f32[1,8], index: 8, kind: input, shape index: {}]   ;;  %s1115_s9 = inlined_call_operand.vmem [shape: f32[8,4], index: 9, kind: input, shape index: {}]   ;;  %s1116_s10 = inlined_call_operand.vmem [shape: f32[1,4], index: 10, kind: input, shape index: {}]   ;;  %s1117_s11 = inlined_call_operand.vmem [shape: f32[2,16,4], index: 11, kind: output, shape index: {}]  }
   0x1 LB: > { %s858_s18 = sadd.s32 4294967295, %s954_s17   ;;  %p862_p0 = scmp.ge.s32.totalorder %s954_s17, 1  ;;  %s954_s17 = sphi %s1018_s17, %s21_s17  }
   0x2   : > { %p337_p1 = scmp.lt.s32.totalorder %s954_s17, 3 }
   0x4   : > { %p338_p2 = pnand %p862_p0, %p337_p1 }
   0x5   : > { %p377_p3 = scmp.lt.s32.totalorder (!%p338_p2), %s858_s18, 1 }
   0x6   : > { %341 = sbr.rel (%p338_p2) target bundleno = 1569 (0x621), region = 64 }
   0xb   : > { %v392_v0 = vld [vmem:[%s1107_s1 + $0x8] sm:$0xff]  ;;  %vm416_vm0 = vcmask 1043456   ;;  %v391_v1 = vld [vmem:[%s1107_s1] sm:$0xff]  ;;  %v956_v2 = vmov 0.0   ;;  %vm957_vm1 = vmmov 0   ;;  %s1119_s18 = smov (!%p377_p3, %s858_s18), 1 }
   0xc   : > { %891 = vmatprep.subr.bf16.mxu0 %v956_v2  ;;  %v395_v3 = vpack.c.bf16 %v392_v0, %v392_v0  ;;  %897 = vmatprep.subr.bf16.mxu1 %v956_v2  ;;  %v394_v4 = vpack.c.bf16 %v391_v1, %v391_v1  ;;  %s921_s23 = smul.u32 24, %s1119_s18  ;;  %vm412_vm2 = vcmask 64512   ;;  %v393_v12 = vld [vmem:[%s1107_s1 + $0x10] sm:$0xff]  ;;  %vm399_vm3 = vsmask.f32 7424  ;;  %v620_v58 = vld [vmem:[%s1111_s5] sm:$0xff] }
   0xd   : > { %893 = vmatprep.mubr.msk.bf16.mxu0 %vm957_vm1, %v956_v2  ;;  %899 = vmatprep.mubr.msk.bf16.mxu1 %vm957_vm1, %v956_v2  ;;  %v396_v16 = vpack.c.bf16 %v393_v12, %v393_v12  ;;  %vm509_vm4 = vcmask 1046528   ;;  %v869_v35 = vld [vmem:[%s1108_s2] ss:$0 sm:$0xff]  ;;  %vm573_vm5 = vcmask 130048   ;;  %v621_v59 = vld [vmem:[%s1111_s5 + $0x8] sm:$0xff]  ;;  %vm778_vm6 = vcmask 31744  }
   0xe   : > { %v418_v5 = vsel %vm416_vm0, %v395_v3, 0  ;;  %v464_v6 = vsel %vm416_vm0, %v394_v4, 0  ;;  %s381_s26 = scalar_lea.vmem %s1106_s0, %s921_s23  ;;  %v622_v60 = vpack.c.bf16 %v621_v59, %v620_v58  ;;  %s880_s13 = sshll.u32 %s1119_s18, 4 }
   0xf   : > { %892 = vmatpush3.bf16.msra.mxu0 %v418_v5  ;;  %898 = vmatpush3.bf16.msra.mxu1 %v464_v6  ;;  %v388_v7 = vld [vmem:[%s381_s26] sm:$0xff]  ;;  %v389_v8 = vld [vmem:[%s381_s26 + $0x8] sm:$0xff]  ;;  %v390_v9 = vld [vmem:[%s381_s26 + $0x10] sm:$0x3]  ;;  %v517_v20 = vsel %vm416_vm0, %v396_v16, 0  ;;  %s386_s16 = scalar_lea.vmem %s1117_s11, %s880_s13 }
  0x10   : > { %903 = vmatprep.subr.bf16.mxu0 %v956_v2  ;;  %909 = vmatprep.subr.bf16.mxu1 %v956_v2  ;;  %v397_v10 = vpack.c.bf16 %v389_v8, %v388_v7  ;;  %v398_v11 = vpack.c.bf16 %v390_v9, %v390_v9  ;;  %v870_v5 = vld [vmem:[%s1109_s3] ss:$0 sm:$0xff] }
  0x11   : > { %v871_v9 = vld [vmem:[%s1110_s4] ss:$0 sm:$0xff] }
  0x12   : > { %v401_v13 = vshrl.u32 %v397_v10, 16  ;;  %v403_v14 = vshll.u32 %v397_v10, 16  ;;  %v408_v15 = vshll.u32 %v398_v11, 16  ;;  %900 = vmatmul.mubr.msk.bf16.vlgmr.msra.gmra.mxu1 %vm412_vm2, %v397_v10  ;;  %v510_v22 = vrot.slane %v397_v10, 1 }
  0x13   : > { %911 = vmatprep.mubr.msk.bf16.mxu1 %vm957_vm1, %v956_v2  ;;  %v511_v23 = vrot.slane %v398_v11, 1  ;;  %910 = vmatpush3.bf16.msra.mxu1 %v622_v60 }
  0x14   : > { %v405_v17 = vrot.slane %v403_v14, 1  ;;  %v410_v18 = vrot.slane %v408_v15, 1  ;;  %v872_v14 = vld [vmem:[%s1112_s6] ss:$0 sm:$0xff] }
  0x15   : > { %v512_v24 = vsel %vm509_vm4, %v510_v22, %v511_v23 }
  0x16   : > { %v406_v19 = vor.u32 %v405_v17, %v401_v13 }
  0x18   : > { %v411_v21 = vsel %vm399_vm3, %v406_v19, %v410_v18 }
  0x19   : > { %894 = vmatmul.mubr.msk.bf16.vlgmr.msra.gmra.mxu0 %vm412_vm2, %v411_v21 }
  0x1a   : > { %904 = vmatpush3.bf16.msra.mxu0 %v517_v20  ;;  %905 = vmatprep.mubr.msk.bf16.mxu0 %vm957_vm1, %v956_v2 }
  0x1b   : > { %915 = vmatprep.subr.bf16.mxu0 %v956_v2 }
  0x21   : > { %906 = vmatmul.mubr.msk.bf16.vlgmr.msra.gmra.mxu0 %vm412_vm2, %v512_v24 }
  0x22   : > { %917 = vmatprep.mubr.msk.bf16.mxu0 %vm957_vm1, %v956_v2 }
  0xd2   : > { %v500_v25 = vpop.f32.mrf.mxu1 }
  0xd4   : > { %v901_v26 = vpop.f32.mrf.mxu1 }
  0xd6   : > { %v503_v27 = vpop.f32.mrf.mxu1 }
  0xd8   : > { %v902_v28 = vpop.f32.mrf.mxu1 }
  0xd9   : > { %v454_v29 = vpop.f32.mrf.mxu0 }
  0xda   : > { %v501_v33 = vadd.f32 %v500_v25, %v454_v29 }
  0xdb   : > { %v895_v30 = vpop.f32.mrf.mxu0 }
  0xdd   : > { %v457_v31 = vpop.f32.mrf.mxu0 }
  0xde   : > { %v504_v38 = vadd.f32 %v503_v27, %v457_v31 }
  0xdf   : > { %v896_v32 = vpop.f32.mrf.mxu0 }
  0xe1   : > { %v553_v34 = vpop.f32.mrf.mxu0 }
  0xe2   : > { %v560_v36 = vadd.f32 %v553_v34, %v501_v33 }
  0xe3   : > { %v907_v37 = vpop.f32.mrf.mxu0 }
  0xe4   : > { %v569_v39 = vadd.f32 %v869_v35, %v560_v36 }
  0xe5   : > { %v556_v40 = vpop.f32.mrf.mxu0 }
  0xe6   : > { %v561_v41 = vadd.f32 %v556_v40, %v504_v38  ;;  %v571_v42 = vmax.f32 %v569_v39, 0.0 }
  0xe7   : > { %v908_v43 = vpop.f32.mrf.mxu0 }
  0xe8   : > { %v570_v44 = vadd.f32 %v869_v35, %v561_v41  ;;  %v574_v45 = vsel %vm573_vm5, %v571_v42, 0.0  ;;  %v722_v35 = vld [vmem:[%s1115_s9] sm:$0xff] }
  0xe9   : > { %575 = vadd.xlane.f32.xlu0 %v574_v45  ;;  %v723_v36 = vpack.c.bf16 %v722_v35, %v722_v35 }
  0xea   : > { %v572_v46 = vmax.f32 %v570_v44, 0.0 }
  0xeb   : > { %v735_v37 = vsel %vm416_vm0, %v723_v36, 0 }
  0xec   : > { %v577_v47 = vsel %vm573_vm5, %v572_v46, 0.0  ;;  %916 = vmatpush3.bf16.msra.mxu0 %v735_v37 }
  0xed   : > { %578 = vadd.xlane.f32.xlu0 %v577_v47 }
 0x172   : > { %v576_v48 = vpop.xlane.xlu0 %575 }
 0x173   : > { %v581_v49 = vmul.f32 0.0625, %v576_v48 }
 0x175   : > { %v583_v50 = vsub.f32 %v571_v42, %v581_v49 }
 0x176   : > { %v579_v51 = vpop.xlane.xlu0 %578 }
 0x177   : > { %v582_v52 = vmul.f32 0.0625, %v579_v51  ;;  %v585_v53 = vmul.f32 %v583_v50, %v583_v50 }
 0x179   : > { %v584_v54 = vsub.f32 %v572_v46, %v582_v52  ;;  %v587_v55 = vsel %vm573_vm5, %v585_v53, 0.0  ;;  %v874_v46 = vld [vmem:[%s1113_s7] ss:$0 sm:$0xff] }
 0x17a   : > { %588 = vadd.xlane.f32.xlu1 %v587_v55  ;;  %v876_v55 = vld [vmem:[%s1116_s10] ss:$0 sm:$0xff] }
 0x17b   : > { %v586_v56 = vmul.f32 %v584_v54, %v584_v54 }
 0x17d   : > { %v590_v57 = vsel %vm573_vm5, %v586_v56, 0.0 }
 0x17e   : > { %591 = vadd.xlane.f32.xlu1 %v590_v57 }
 0x203   : > { %v589_v61 = vpop.xlane.xlu1 %588 }
 0x204   : > { %v593_v62 = vmul.f32 0.0625, %v589_v61 }
 0x206   : > { %v595_v63 = vadd.f32 1e-06, %v593_v62 }
 0x207   : > { %v592_v0 = vpop.xlane.xlu1 %591 }
 0x208   : > { %932 = vrsqrt.f32 %v595_v63  ;;  %v594_v1 = vmul.f32 0.0625, %v592_v0 }
 0x20a   : > { %v596_v2 = vadd.f32 1e-06, %v594_v1 }
 0x20c   : > { %934 = vrsqrt.f32 %v596_v2 }
 0x215   : > { %v933_v3 = vpop.eup %932 }
 0x216   : > { %v599_v4 = vmul.f32 %v933_v3, %v583_v50  ;;  %v875_v50 = vld [vmem:[%s1114_s8] ss:$0 sm:$0xff] }
 0x218   : > { %v608_v8 = vmul.f32 %v870_v5, %v599_v4 }
 0x219   : > { %v935_v6 = vpop.eup %934 }
 0x21a   : > { %v600_v7 = vmul.f32 %v935_v6, %v584_v54  ;;  %v617_v11 = vadd.f32 %v871_v9, %v608_v8 }
 0x21c   : > { %v609_v10 = vmul.f32 %v870_v5, %v600_v7 }
 0x21e   : > { %v618_v12 = vadd.f32 %v871_v9, %v609_v10 }
 0x220   : > { %v619_v13 = vpack.c.bf16 %v618_v12, %v617_v11 }
 0x222   : > { %912 = vmatmul.mubr.msk.bf16.vlgmr.msra.gmra.mxu1 %vm573_vm5, %v619_v13 }
 0x2e2   : > { %v667_v15 = vpop.f32.mrf.mxu1 }
 0x2e3   : > { %v668_v16 = vadd.f32 %v872_v14, %v667_v15 }
 0x2e4   : > { %v913_v17 = vpop.f32.mrf.mxu1 }
 0x2e5   : > { %v674_v18 = vmax.f32 %v668_v16, 0.0 }
 0x2e6   : > { %v670_v19 = vpop.f32.mrf.mxu1 }
 0x2e7   : > { %v671_v20 = vadd.f32 %v872_v14, %v670_v19  ;;  %v676_v21 = vsel %vm412_vm2, %v674_v18, 0.0 }
 0x2e8   : > { %677 = vadd.xlane.f32.xlu0 %v676_v21  ;;  %v914_v22 = vpop.f32.mrf.mxu1 }
 0x2e9   : > { %v675_v23 = vmax.f32 %v671_v20, 0.0 }
 0x2eb   : > { %v679_v24 = vsel %vm412_vm2, %v675_v23, 0.0 }
 0x2ec   : > { %680 = vadd.xlane.f32.xlu1 %v679_v24 }
 0x371   : > { %v678_v25 = vpop.xlane.xlu0 %677 }
 0x372   : > { %v683_v26 = vmul.f32 0.125, %v678_v25 }
 0x374   : > { %v685_v27 = vsub.f32 %v674_v18, %v683_v26 }
 0x375   : > { %v681_v28 = vpop.xlane.xlu1 %680 }
 0x376   : > { %v684_v29 = vmul.f32 0.125, %v681_v28  ;;  %v687_v30 = vmul.f32 %v685_v27, %v685_v27 }
 0x378   : > { %v686_v31 = vsub.f32 %v675_v23, %v684_v29  ;;  %v689_v32 = vsel %vm412_vm2, %v687_v30, 0.0 }
 0x379   : > { %690 = vadd.xlane.f32.xlu0 %v689_v32 }
 0x37a   : > { %v688_v33 = vmul.f32 %v686_v31, %v686_v31 }
 0x37c   : > { %v692_v34 = vsel %vm412_vm2, %v688_v33, 0.0 }
 0x37d   : > { %693 = vadd.xlane.f32.xlu1 %v692_v34 }
 0x402   : > { %v691_v38 = vpop.xlane.xlu0 %690 }
 0x403   : > { %v695_v39 = vmul.f32 0.125, %v691_v38 }
 0x405   : > { %v697_v40 = vadd.f32 1e-06, %v695_v39 }
 0x406   : > { %v694_v41 = vpop.xlane.xlu1 %693 }
 0x407   : > { %936 = vrsqrt.f32 %v697_v40  ;;  %v696_v42 = vmul.f32 0.125, %v694_v41 }
 0x409   : > { %v698_v43 = vadd.f32 1e-06, %v696_v42 }
 0x40b   : > { %938 = vrsqrt.f32 %v698_v43 }
 0x414   : > { %v937_v44 = vpop.eup %936 }
 0x415   : > { %v701_v45 = vmul.f32 %v937_v44, %v685_v27 }
 0x417   : > { %v710_v49 = vmul.f32 %v874_v46, %v701_v45 }
 0x418   : > { %v939_v47 = vpop.eup %938 }
 0x419   : > { %v702_v48 = vmul.f32 %v939_v47, %v686_v31  ;;  %v719_v52 = vadd.f32 %v875_v50, %v710_v49 }
 0x41b   : > { %v711_v51 = vmul.f32 %v874_v46, %v702_v48 }
 0x41d   : > { %v720_v53 = vadd.f32 %v875_v50, %v711_v51 }
 0x41f   : > { %v721_v54 = vpack.c.bf16 %v720_v53, %v719_v52 }
 0x421   : > { %918 = vmatmul.mubr.msk.bf16.vlgmr.msra.gmra.mxu0 %vm412_vm2, %v721_v54 }
 0x4e1   : > { %v771_v56 = vpop.f32.mrf.mxu0 }
 0x4e2   : > { %v772_v57 = vadd.f32 %v876_v55, %v771_v56 }
 0x4e3   : > { %v919_v58 = vpop.f32.mrf.mxu0 }
 0x4e4   : > { %v779_v59 = vsel %vm778_vm6, %v772_v57, -inf }
 0x4e5   : > { %780 = vmax.xlane.f32.xlu0 %v779_v59  ;;  %v774_v60 = vpop.f32.mrf.mxu0 }
 0x4e6   : > { %v775_v61 = vadd.f32 %v876_v55, %v774_v60 }
 0x4e7   : > { %v920_v62 = vpop.f32.mrf.mxu0 }
 0x4e8   : > { %v782_v63 = vsel %vm778_vm6, %v775_v61, -inf }
 0x4e9   : > { %783 = vmax.xlane.f32.xlu1 %v782_v63 }
 0x56e   : > { %v781_v0 = vpop.xlane.xlu0 %780 }
 0x56f   : > { %v785_v1 = vsub.f32 %v772_v57, %v781_v0 }
 0x571   : > { %v787_v2 = vmul.f32 1.442695, %v785_v1 }
 0x572   : > { %v784_v3 = vpop.xlane.xlu1 %783 }
 0x573   : > { %940 = vpow2.f32 %v787_v2  ;;  %v786_v4 = vsub.f32 %v775_v61, %v784_v3 }
 0x575   : > { %v789_v5 = vmul.f32 1.442695, %v786_v4 }
 0x577   : > { %942 = vpow2.f32 %v789_v5 }
 0x580   : > { %v941_v6 = vpop.eup %940 }
 0x581   : > { %v791_v7 = vsel %vm778_vm6, %v941_v6, 0.0 }
 0x582   : > { %792 = vadd.xlane.f32.xlu0 %v791_v7 }
 0x584   : > { %v943_v8 = vpop.eup %942 }
 0x585   : > { %v794_v9 = vsel %vm778_vm6, %v943_v8, 0.0 }
 0x586   : > { %795 = vadd.xlane.f32.xlu1 %v794_v9 }
 0x60b   : > { %v793_v10 = vpop.xlane.xlu0 %792 }
 0x60c   : > { %944 = vrcp.f32 %v793_v10 }
 0x60f   : > { %v796_v11 = vpop.xlane.xlu1 %795 }
 0x610   : > { %946 = vrcp.f32 %v796_v11 }
 0x619   : > { %v945_v12 = vpop.eup %944 }
 0x61a   : > { %v799_v13 = vmul.f32 %v945_v12, %v941_v6 }
 0x61c   : > { %801 = vst.msk [vmem:[%s386_s16] sm:$0xff] %vm778_vm6, %v799_v13 }
 0x61d   : > { %v947_v14 = vpop.eup %946 }
 0x61e   : > { %v800_v15 = vmul.f32 %v947_v14, %v943_v8 }
 0x620   : > { %802 = vst.msk [vmem:[%s386_s16 + $0x8] sm:$0xff] %vm778_vm6, %v800_v15 }
 0x621 PF: > { %s21_s17 = sadd.s32 1, %s954_s17  }
 0x622   : > { %p18_p4 = scmp.ge.s32.totalorder %s21_s17, 4  }
 0x624   :  { %20 = sbr.rel (!%p18_p4) target bundleno = 1 (0x1), region = 94 }

</bundles_post_ra>
